<compile_context>
chip_gen: v7x
topology: tpu7x:2x2x1
jax: 0.10.0
libtpu: 0.0.40
codegen_flags: <defaults>
</compile_context>

<pallas_src>
import math

import jax
import jax.numpy as jnp
import numpy as np
from jax.experimental import pallas as pl
from jax.experimental.pallas import tpu as pltpu


def attention_kernel(enc_ref, w_e_ref, b_eff_ref, v_ref, out_ref):
    # enc_ref   : [TB*L, 2E] bf16  encoder outputs, batch rows flattened with src_len
    # w_e_ref   : [2E, dec]  bf16  encoder half of attn.weight (pre-transposed)
    # b_eff_ref : [1, dec]   f32   attn.bias + hidden_flat @ W_h   (hidden term pre-folded)
    # v_ref     : [1, dec]   f32   v.weight as a row
    # out_ref   : [TB, L]    f32   softmax attention weights
    tb, L = out_ref.shape
    dec = w_e_ref.shape[1]

    # Single big-M MXU matmul (bf16 inputs, f32 accumulation), tanh in f32.
    energy = jnp.tanh(
        jnp.dot(enc_ref[...], w_e_ref[...], preferred_element_type=jnp.float32)
        + b_eff_ref[...]                                            # broadcast over rows
    )                                                               # [TB*L, dec] f32

    # score = energy @ v^T as VPU multiply + lane reduce (avoids an N=1 MXU matvec and
    # leaves the result directly in the (TB, L) layout the softmax / store want).
    score = jnp.sum(energy.reshape(tb, L, dec) * v_ref[...], axis=-1)   # [TB, L]

    # softmax over src_len (last axis here == torch dim=1); exact divide so every row
    # sums to 1 up to f32 rounding.
    m = jnp.max(score, axis=-1, keepdims=True)
    e = jnp.exp(score - m)
    out_ref[...] = e / jnp.sum(e, axis=-1, keepdims=True)


def _round_up(x, m):
    return ((x + m - 1) // m) * m


def _pick_block_b(B, L, two_e, dec, *, enc_itemsize=2,
                  vmem_budget_bytes=24 * 1024 * 1024, min_grid_steps=1):
    """Batch rows per grid step, sized against a per-step VMEM budget.

    The accounting rounds every minor (lane) dim up to 128: small minor dims (dec, L,
    2E < 128) physically occupy full 128-lane tiles in VMEM, so raw byte counts would
    under-estimate by up to 128/minor_dim.  The 24 MiB budget (double buffering included)
    stays inside the explicitly raised scoped-VMEM limit on v5e/v6e (128 MiB physical)
    and v7x (64 MiB per TensorCore).
    """
    lanepad = lambda n: _round_up(n, 128)
    per_b = (
        2 * L * lanepad(two_e) * enc_itemsize    # enc block (bf16), double-buffered
        + 2 * lanepad(L) * 4                     # (TB, L) f32 output block, double-buffered
        + 2 * L * lanepad(dec) * 4               # energy + exp intermediates (f32)
        + 4 * lanepad(L) * 4                     # score / max / denom / softmax scratch
    )
    tb = max(1, vmem_budget_bytes // max(per_b, 1))
    if tb >= B:
        tb = B                                   # single full-extent block: no tiling needed
    else:
        tb = max(16, (tb // 16) * 16)            # keep TB*L sublane-aligned for packed bf16
    # Optional split across TensorCores: only useful on v7x (2 TC/chip); on v5e/v6e the
    # grid is a serial loop so forcing >1 step is pure overhead (caller opts in).
    if min_grid_steps > 1 and B >= 16 * min_grid_steps:
        tb = min(tb, _round_up(pl.cdiv(B, min_grid_steps), 16))
    return tb


def attention_pallas(hidden, encoder_outputs, w_attn, b_attn, w_v, *,
                     block_b=None, min_grid_steps=1):
    """hidden: [2, dec], encoder_outputs: [B, L, 2*enc]; returns [B, L] softmax weights."""
    B, L, two_e = encoder_outputs.shape
    hidden_flat = jnp.asarray(hidden, jnp.float32).reshape(1, -1)   # [1, 2D]
    two_d = hidden_flat.shape[1]
    dec = w_attn.shape[0]

    w = jnp.asarray(w_attn, jnp.float32)
    w_h = w[:, :two_d].T                                            # [2D, dec] (hidden half)
    w_e = w[:, two_d:].T                                            # [2E, dec] (encoder half)
    # Fold the batch/step-invariant hidden contribution into the bias (stays f32).
    b_eff = jnp.asarray(b_attn, jnp.float32).reshape(1, dec) + hidden_flat @ w_h   # [1, dec]
    v_row = jnp.asarray(w_v, jnp.float32).reshape(1, dec)           # [1, dec]

    # bf16 encoder stream and weight for the MXU (f32 accumulate): halves HBM traffic of
    # the dominant input.  Flatten (B, L, 2E) -> (B*L, 2E) here (free contiguous reshape)
    # so the kernel's MXU operand needs no in-kernel relayout.  If encoder_outputs is
    # already bf16 upstream the cast is a no-op.
    enc2d = encoder_outputs.reshape(B * L, two_e).astype(jnp.bfloat16)
    w_e = w_e.astype(jnp.bfloat16)

    if block_b is None:
        block_b = _pick_block_b(B, L, two_e, dec,
                                enc_itemsize=enc2d.dtype.itemsize,
                                min_grid_steps=min_grid_steps)
    block_b = min(block_b, B)
    grid = pl.cdiv(B, block_b)      # partial tail block instead of a jnp.pad HBM copy

    out = pl.pallas_call(
        attention_kernel,
        out_shape=jax.ShapeDtypeStruct((B, L), jnp.float32),
        grid_spec=pltpu.PrefetchScalarGridSpec(
            num_scalar_prefetch=0,
            grid=(grid,),
            in_specs=[
                pl.BlockSpec((block_b * L, two_e), lambda i: (i, 0)),  # encoder rows per step
                pl.BlockSpec((two_e, dec), lambda i: (0, 0)),          # W_e (replicated)
                pl.BlockSpec((1, dec), lambda i: (0, 0)),              # folded bias
                pl.BlockSpec((1, dec), lambda i: (0, 0)),              # v row
            ],
            out_specs=pl.BlockSpec((block_b, L), lambda i: (i, 0)),    # (TB, L) output slab
        ),
        compiler_params=pltpu.CompilerParams(
            dimension_semantics=("parallel",),
            vmem_limit_bytes=48 << 20,      # above scoped defaults, below v7x's 64 MiB/TC
        ),
    )(enc2d, w_e, b_eff, v_row)

    return out


if __name__ == "__main__":
    enc_hid, dec_hid = 16, 32
    B, L = 2, 8
    feat = 2 * enc_hid + 2 * dec_hid

    key = jax.random.PRNGKey(0)
    k1, k2, k3, k4, k5 = jax.random.split(key, 5)

    # Deterministic parameters (shapes from nn.Linear in __init__), ~PyTorch default init ranges.
    bound_a = 1.0 / math.sqrt(feat)
    bound_v = 1.0 / math.sqrt(dec_hid)
    w_attn = jax.random.uniform(k1, (dec_hid, feat), jnp.float32, -bound_a, bound_a)
    b_attn = jax.random.uniform(k2, (dec_hid,), jnp.float32, -bound_a, bound_a)
    w_v = jax.random.uniform(k3, (1, dec_hid), jnp.float32, -bound_v, bound_v)

    # Inputs implied by the forward pass.
    hidden = jax.random.normal(k4, (2, dec_hid), jnp.float32)            # [num_dirs, dec_hid]
    encoder_outputs = jax.random.normal(k5, (B, L, 2 * enc_hid), jnp.float32)

    out = attention_pallas(hidden, encoder_outputs, w_attn, b_attn, w_v)
    out = jax.block_until_ready(out)

    # Pure-JAX f32 reference of the exact PyTorch forward.
    h_flat = hidden.reshape(-1)
    h_rep = jnp.broadcast_to(h_flat, (B, L, 2 * dec_hid))
    x = jnp.concatenate([h_rep, encoder_outputs], axis=2)
    energy = jnp.tanh(x @ w_attn.T + b_attn)
    att = (energy @ w_v.T)[..., 0]
    ref = jax.nn.softmax(att, axis=1)

    assert out.shape == (B, L)
    # 1e-2 tolerance vs the f32 reference: expected bf16 quantization of the encoder
    # stream / W_e inside the kernel (observed deviation is ~1e-3).
    assert np.allclose(np.asarray(out), np.asarray(ref), atol=1e-2, rtol=1e-2)
    # Exact-divide softmax: every row sums to 1 up to f32 rounding.
    assert np.allclose(np.asarray(out).sum(axis=1), 1.0, atol=1e-5)
    print("KERNEL_OK")
</pallas_src>

<mosaic_0001>
module attributes {stable_mosaic.version = 11 : i64} {
  func.func @attention_kernel(%arg0: i32, %arg1: memref<16x32xbf16, #tpu.memory_space<vmem>>, %arg2: memref<32x32xbf16, #tpu.memory_space<vmem>>, %arg3: memref<1x32xf32, #tpu.memory_space<vmem>>, %arg4: memref<1x32xf32, #tpu.memory_space<vmem>>, %arg5: memref<2x8xf32, #tpu.memory_space<vmem>>) attributes {dimension_semantics = [#tpu.dimension_semantics<parallel>], iteration_bounds = array<i64: 1>, scalar_prefetch = 0 : i64, scratch_operands = 0 : i64, tpu.core_type = #tpu.core_type<tc>, window_params = [{transform_indices = @transform_0, window_bounds = array<i64: 16, 32>}, {pipeline_mode = #tpu.pipeline_mode<synchronous>, transform_indices = @transform_1, window_bounds = array<i64: 32, 32>}, {pipeline_mode = #tpu.pipeline_mode<synchronous>, transform_indices = @transform_2, window_bounds = array<i64: 1, 32>}, {pipeline_mode = #tpu.pipeline_mode<synchronous>, transform_indices = @transform_3, window_bounds = array<i64: 1, 32>}, {transform_indices = @transform_4, window_bounds = array<i64: 2, 8>}]} {
    %c0 = arith.constant 0 : index
    %c0_0 = arith.constant 0 : index
    %0 = vector.load %arg1[%c0, %c0_0] : memref<16x32xbf16, #tpu.memory_space<vmem>>, vector<16x32xbf16>
    %c0_1 = arith.constant 0 : index
    %c0_2 = arith.constant 0 : index
    %1 = vector.load %arg2[%c0_1, %c0_2] : memref<32x32xbf16, #tpu.memory_space<vmem>>, vector<32x32xbf16>
    %cst = arith.constant dense<0.000000e+00> : vector<16x32xf32>
    %2 = tpu.matmul %0, %1, %cst {dimension_numbers = #tpu.dot_dimension_numbers<[1], [0], [0], [1], [0, 0, 1, 1], [], []>} : vector<16x32xbf16>, vector<32x32xbf16>, vector<16x32xf32> -> vector<16x32xf32>
    %c0_3 = arith.constant 0 : index
    %c0_4 = arith.constant 0 : index
    %3 = vector.load %arg3[%c0_3, %c0_4] : memref<1x32xf32, #tpu.memory_space<vmem>>, vector<1x32xf32>
    %4 = vector.broadcast %3 : vector<1x32xf32> to vector<16x32xf32>
    %5 = arith.addf %2, %4 : vector<16x32xf32>
    %6 = math.tanh %5 : vector<16x32xf32>
    %7 = vector.shape_cast %6 : vector<16x32xf32> to vector<2x8x32xf32>
    %c0_5 = arith.constant 0 : index
    %c0_6 = arith.constant 0 : index
    %8 = vector.load %arg4[%c0_5, %c0_6] : memref<1x32xf32, #tpu.memory_space<vmem>>, vector<1x32xf32>
    %9 = vector.shape_cast %8 : vector<1x32xf32> to vector<1x1x32xf32>
    %10 = vector.broadcast %9 : vector<1x1x32xf32> to vector<2x8x32xf32>
    %11 = arith.mulf %7, %10 : vector<2x8x32xf32>
    %cst_7 = arith.constant dense<0.000000e+00> : vector<2x8xf32>
    %12 = vector.multi_reduction <add>, %11, %cst_7 [2] : vector<2x8x32xf32> to vector<2x8xf32>
    %cst_8 = arith.constant dense<0xFF800000> : vector<2xf32>
    %13 = vector.multi_reduction <maximumf>, %12, %cst_8 [1] : vector<2x8xf32> to vector<2xf32>
    %14 = vector.shape_cast %13 : vector<2xf32> to vector<2x1xf32>
    %15 = vector.broadcast %14 : vector<2x1xf32> to vector<2x8xf32>
    %16 = arith.subf %12, %15 : vector<2x8xf32>
    %17 = math.exp %16 : vector<2x8xf32>
    %cst_9 = arith.constant dense<0.000000e+00> : vector<2xf32>
    %18 = vector.multi_reduction <add>, %17, %cst_9 [1] : vector<2x8xf32> to vector<2xf32>
    %19 = vector.shape_cast %18 : vector<2xf32> to vector<2x1xf32>
    %20 = vector.broadcast %19 : vector<2x1xf32> to vector<2x8xf32>
    %21 = arith.divf %17, %20 : vector<2x8xf32>
    %c0_10 = arith.constant 0 : index
    %c0_11 = arith.constant 0 : index
    %22 = vector.load %arg5[%c0_10, %c0_11] : memref<2x8xf32, #tpu.memory_space<vmem>>, vector<2x8xf32>
    tpu.vector_store %arg5[%c0_10, %c0_11], %21 {strides = array<i32>} : memref<2x8xf32, #tpu.memory_space<vmem>>, vector<2x8xf32>,
    return
  }
  func.func @transform_0(%arg0: i32) -> (i32, i32) {
    %c0_i32 = arith.constant 0 : i32
    %c0_i32_0 = arith.constant 0 : i32
    return %arg0, %c0_i32 : i32, i32
  }
  func.func @transform_1(%arg0: i32) -> (i32, i32) {
    %c0_i32 = arith.constant 0 : i32
    %c0_i32_0 = arith.constant 0 : i32
    %c0_i32_1 = arith.constant 0 : i32
    return %c0_i32, %c0_i32_0 : i32, i32
  }
  func.func @transform_2(%arg0: i32) -> (i32, i32) {
    %c0_i32 = arith.constant 0 : i32
    %c0_i32_0 = arith.constant 0 : i32
    %c0_i32_1 = arith.constant 0 : i32
    return %c0_i32, %c0_i32_0 : i32, i32
  }
  func.func @transform_3(%arg0: i32) -> (i32, i32) {
    %c0_i32 = arith.constant 0 : i32
    %c0_i32_0 = arith.constant 0 : i32
    %c0_i32_1 = arith.constant 0 : i32
    return %c0_i32, %c0_i32_0 : i32, i32
  }
  func.func @transform_4(%arg0: i32) -> (i32, i32) {
    %c0_i32 = arith.constant 0 : i32
    %c0_i32_0 = arith.constant 0 : i32
    return %arg0, %c0_i32 : i32, i32
  }
}

</mosaic_0001>

<bundles_post_ra>
// kernel: tpu_custom_call.1
= control target key start
LH: loop header
LB: loop body
LE: loop exit
PB: predicated region body
PF: predicated region fallthrough
CT: control target
= control target key end

     0   :  { %9 = vsyncpa [#allocation3], 0  ;;  %s444_s0 = inlined_call_operand.hbm [shape: bf16[16,32], index: 0, kind: input, shape index: {}]   ;;  %s445_s1 = inlined_call_operand.hbm [shape: bf16[32,32], index: 1, kind: input, shape index: {}]   ;;  %s446_s2 = inlined_call_operand.vmem [shape: f32[1,32], index: 2, kind: input, shape index: {}]   ;;  %s447_s3 = inlined_call_operand.vmem [shape: f32[1,32], index: 3, kind: input, shape index: {}]   ;;  %s448_s4 = inlined_call_operand.hbm [shape: f32[2,8], index: 4, kind: output, shape index: {}]  }
   0x1   :  { %10 = vsyncpa [#allocation6], 0 }
   0x2   :  { %11 = vsyncpa [#allocation4], 0  ;;  %s360_s15 = smov [#allocation2]   ;;  %s288_s19 = scalar_lea.hbm %s444_s0, 128 }
   0x3   :  { %s17_s16 = sshll.u32 %s360_s15, 4  ;;  %p289_p0 = scmp.ne.s32.totalorder %s444_s0, %s288_s19  ;;  %s18_s16 = int_to_ptr.vmem [resolvable:$true] %s17_s16 }
   0x4   :  { %p292_p1 = scmp.lt.u32.totalorder %s288_s19, %s444_s0 }
   0x6   :  { %p294_p2 = pnand %p292_p1, %p289_p0 }
   0x8   :  { %297 = shalt.err (!%p294_p2)
}
   0x9   :  { %s298_s24 = scalar_lea.vmem %s18_s16, 128  ;;  %p303_p4 = scmp.lt.s32.totalorder %s18_s16, %s18_s16 }
   0xa   :  { %p299_p3 = scmp.ne.s32.totalorder %s18_s16, %s298_s24  ;;  %p304_p5 = scmp.lt.s32.totalorder %s298_s24, %s298_s24 }
   0xc   :  { %p305_p6 = por %p304_p5, %p303_p4 }
   0xe   :  { %p306_p7 = pnand %p305_p6, %p299_p3 }
  0x10   :  { %309 = shalt.err (!%p306_p7)
}
  0x11   :  { %s361_s25 = smov 64   ;;  %s362_s26 = smov 4  }
  0x12   :  { %23 = dma.hbm_to_vmem [thread:$0]  %s444_s0, 128, %s18_s16, [#allocation3], %s361_s25, %s361_s25, %s362_s26  }
  0x13   :  { %s363_s29 = smov [#allocation5]   ;;  %s310_s7 = scalar_lea.hbm %s445_s1, 256 }
  0x14   :  { %s29_s30 = sshll.u32 %s363_s29, 4  ;;  %p311_p8 = scmp.ne.s32.totalorder %s445_s1, %s310_s7  ;;  %s30_s30 = int_to_ptr.vmem [resolvable:$true] %s29_s30 }
  0x15   :  { %p314_p9 = scmp.lt.u32.totalorder %s310_s7, %s445_s1 }
  0x17   :  { %p316_p10 = pnand %p314_p9, %p311_p8 }
  0x19   :  { %319 = shalt.err (!%p316_p10)
}
  0x1a   :  { %s320_s12 = scalar_lea.vmem %s30_s30, 256  ;;  %p325_p12 = scmp.lt.s32.totalorder %s30_s30, %s30_s30 }
  0x1b   :  { %p321_p11 = scmp.ne.s32.totalorder %s30_s30, %s320_s12  ;;  %p326_p13 = scmp.lt.s32.totalorder %s320_s12, %s320_s12 }
  0x1d   :  { %p327_p0 = por %p326_p13, %p325_p12 }
  0x1f   :  { %p328_p1 = pnand %p327_p0, %p321_p11 }
  0x21   :  { %331 = shalt.err (!%p328_p1)
}
  0x22   :  { %35 = dma.hbm_to_vmem [thread:$0]  %s445_s1, 256, %s30_s30, [#allocation6], %s361_s25, %s361_s25, %s362_s26  }
  0x23   :  { %354 = dma.done.wait [#allocation3], 128  }
  0x24   :  { %355 = vsyncadd [#allocation3], 4294967168 }
  0x25   :  { %356 = dma.done.wait [#allocation6], 256  }
  0x26   :  { %357 = vsyncadd [#allocation6], 4294967040  ;;  %v364_v0 = vmov 0.0   ;;  %vm365_vm0 = vmmov 0   ;;  %v273_v1 = vld [vmem:[#allocation5] sm:$0xff]   ;;  %v274_v2 = vld [vmem:[#allocation5 + $0x8] sm:$0xff]   ;;  %v141_v18 = vlaneseq }
  0x27   :  { %255 = vmatprep.subr.bf16.mxu0 %v364_v0  ;;  %259 = vmatprep.mubr.msk.bf16.mxu0 %vm365_vm0, %v364_v0  ;;  %v275_v3 = vld [vmem:[#allocation2] sm:$0xff]   ;;  %vm77_vm1 = vcmask 261120   ;;  %vm151_vm2 = vcmask 1041409   ;;  %vm154_vm3 = vcmask 58368   ;;  %v366_v28 = vmov 0  }
  0x28   :  { %256 = vmatpush3.bf16.msra.mxu0 %v273_v1  ;;  %v246_v4 = vld [vmem:[%s446_s2] ss:$0 sm:$0xff]  ;;  %v142_v19 = vand.u32 127, %v141_v18  ;;  %v144_v20 = vshrl.u32 %v141_v18, 7  ;;  %272 = vset.pattern.permute.xlu0 %v366_v28  ;;  %s367_s2 = smov [#allocation7]  }
  0x29   :  { %257 = vmatprep.subr.bf16.mxu0 %v364_v0  ;;  %v251_v11 = vld [vmem:[%s447_s3] ss:$0 sm:$0xff]  ;;  %271 = vset.pattern.permute.xlu1 %v366_v28  ;;  %s236_s3 = sshll.u32 %s367_s2, 4  ;;  %s237_s3 = int_to_ptr.vmem [resolvable:$true] %s236_s3 }
  0x2a   :  { %v145_v22 = vsub.s32 %v142_v19, %v144_v20  ;;  %v161_v29 = vsub.s32 0, %v144_v20  ;;  %v165_v30 = vsub.s32 1, %v144_v20  ;;  %s332_s17 = scalar_lea.vmem %s237_s3, 32  ;;  %p337_p3 = scmp.lt.s32.totalorder %s237_s3, %s237_s3 }
  0x2b   :  { %p333_p2 = scmp.ne.s32.totalorder %s237_s3, %s332_s17  ;;  %p338_p4 = scmp.lt.s32.totalorder %s332_s17, %s332_s17 }
  0x2c   :  { %258 = vmatpush3.bf16.msra.mxu0 %v274_v2 }
  0x2d   :  { %p339_p5 = por %p338_p4, %p337_p3 }
  0x2f   :  { %260 = vmatmul.mubr.msk.bf16.vlgmr.msra.gmra.mrb[0].mxu0 %vm77_vm1, %v275_v3  ;;  %p340_p6 = pnand %p339_p5, %p333_p2 }
 0x102   :  { %v115_v5 = vpop.f32.mrb[0].mxu0 }
 0x103   :  { %v116_v6 = vadd.f32 %v246_v4, %v115_v5  ;;  %v261_v7 = vpop.f32.mrb[1].mxu0 }
 0x104   :  { %v118_v8 = vpop.f32.mrb[2].mxu0 }
 0x105   :  { %276 = vtanh.f32 %v116_v6  ;;  %v119_v9 = vadd.f32 %v246_v4, %v118_v8  ;;  %v262_v10 = vpop.f32.mrb[3].mxu0 }
 0x107   :  { %278 = vtanh.f32 %v119_v9 }
 0x10f   :  { %v277_v12 = vpop.eup %276 }
 0x110   :  { %v131_v13 = vmul.f32 %v277_v12, %v251_v11 }
 0x111   :  { %v279_v14 = vpop.eup %278 }
 0x112   :  { %v133_v15 = vsel %vm77_vm1, %v131_v13, 0.0  ;;  %v132_v16 = vmul.f32 %v279_v14, %v251_v11 }
 0x113   :  { %134 = vadd.xlane.f32.xlu0 %v133_v15 }
 0x114   :  { %v136_v17 = vsel %vm77_vm1, %v132_v16, 0.0 }
 0x117   :  { %137 = vadd.xlane.f32.xlu0 %v136_v17 }
 0x1a0   :  { %v135_v21 = vpop.xlane.xlu0 %134 }
 0x1a1   :  { %v146_v24 = vrot.slane %v135_v21, %v145_v22 }
 0x1a4   :  { %v138_v23 = vpop.xlane.xlu0 %137 }
 0x1a5   :  { %v150_v25 = vrot.slane %v138_v23, %v145_v22 }
 0x1a7   :  { %v152_v26 = vsel %vm151_vm2, %v150_v25, %v146_v24 }
 0x1a8   :  { %v155_v27 = vsel %vm154_vm3, %v152_v26, -inf }
 0x1a9   :  { %156 = vmax.xlane.f32.xlu1 %v155_v27 }
 0x236   :  { %v157_v31 = vpop.xlane.xlu1 %156 }
 0x237   :  { %v162_v32 = vrot.slane %v157_v31, %v161_v29  ;;  %v166_v33 = vrot.slane %v157_v31, %v165_v30 }
 0x239   :  { %v169_v34 = vsub.f32 %v135_v21, %v162_v32  ;;  %v170_v35 = vsub.f32 %v138_v23, %v166_v33 }
 0x23b   :  { %v171_v36 = vmul.f32 1.442695, %v169_v34  ;;  %v173_v37 = vmul.f32 1.442695, %v170_v35 }
 0x23d   :  { %280 = vpow2.f32 %v171_v36 }
 0x23e   :  { %282 = vpow2.f32 %v173_v37 }
 0x247   :  { %v281_v38 = vpop.eup %280 }
 0x248   :  { %v283_v39 = vpop.eup %282  ;;  %178 = vperm.xlu1 %271, %v281_v38  }
 0x249   :  { %181 = vperm.xlu0 %272, %v283_v39  }
 0x2c7   :  { %v179_v40 = vpop.permute.xlu1 %178 }
 0x2c8   :  { %v182_v41 = vpop.permute.xlu0 %181  ;;  %v186_v42 = vrot.slane %v179_v40, %v145_v22 }
 0x2c9   :  { %v190_v43 = vrot.slane %v182_v41, %v145_v22 }
 0x2cb   :  { %v191_v44 = vsel %vm151_vm2, %v190_v43, %v186_v42 }
 0x2cc   :  { %v193_v45 = vsel %vm154_vm3, %v191_v44, 0.0 }
 0x2cd   :  { %194 = vadd.xlane.f32.xlu1 %v193_v45 }
 0x35a   :  { %v195_v46 = vpop.xlane.xlu1 %194 }
 0x35b   :  { %v200_v47 = vrot.slane %v195_v46, %v161_v29  ;;  %v204_v48 = vrot.slane %v195_v46, %v165_v30 }
 0x35d   :  { %284 = vrcp.f32 %v200_v47 }
 0x35e   :  { %286 = vrcp.f32 %v204_v48 }
 0x367   :  { %v285_v49 = vpop.eup %284 }
 0x368   :  { %v208_v50 = vmul.f32 %v285_v49, %v281_v38  ;;  %v287_v51 = vpop.eup %286 }
 0x369   :  { %v210_v52 = vmul.f32 %v287_v51, %v283_v39 }
 0x36a   :  { %214 = vperm.xlu0 %272, %v208_v50  }
 0x36e   :  { %217 = vperm.xlu0 %272, %v210_v52  }
 0x3e9   :  { %v215_v53 = vpop.permute.xlu0 %214 }
 0x3ea   :  { %v222_v55 = vrot.slane %v215_v53, %v145_v22 }
 0x3ed   :  { %v218_v54 = vpop.permute.xlu0 %217 }
 0x3ee   :  { %v226_v56 = vrot.slane %v218_v54, %v145_v22 }
 0x3f0   :  { %v227_v57 = vsel %vm151_vm2, %v226_v56, %v222_v55 }
 0x3f1   :  { %229 = vst.msk [vmem:[#allocation7] sm:$0x3] %vm154_vm3, %v227_v57 }
 0x3f2   :  { %343 = shalt.err (!%p340_p6)
}
 0x3f3   :  { %s344_s20 = scalar_lea.hbm %s448_s4, 32 }
 0x3f4   :  { %p345_p7 = scmp.ne.s32.totalorder %s448_s4, %s344_s20  ;;  %p348_p8 = scmp.lt.u32.totalorder %s344_s20, %s448_s4 }
 0x3f6   :  { %p350_p9 = pnand %p348_p8, %p345_p7 }
 0x3f8   :  { %353 = shalt.err (!%p350_p9)
}
 0x3f9   :  { %239 = dma.vmem_to_hbm [thread:$0]  %s237_s3, 32, %s448_s4, [#allocation4]  }
 0x3fa   :  { %358 = dma.done.wait [#allocation4], 32  }
 0x3fb   :  { %359 = vsyncadd [#allocation4], 4294967264 }
 0x3fc   :  { %243 = vsyncpa [#allocation3], 1 }
 0x3fd   :  { %244 = vsyncpa [#allocation6], 1 }
 0x3fe   :  { %245 = vsyncpa [#allocation4], 1 }

</bundles_post_ra>
